<compile_context>
chip_gen: v5e
topology: v5e:2x2
jax: 0.10.0
libtpu: 0.0.40
codegen_flags: <defaults>
</compile_context>

<pallas_src>
import jax
import jax.numpy as jnp
from jax.experimental import pallas as pl
from jax.experimental.pallas import tpu as pltpu


def _round_up(x, m):
    return (x + m - 1) // m * m


def clip_embedding_kernel(tok_ref, emb_hbm, pos_ref, out_ref, row_buf, sems):
    """One grid step: gather `chunk` embedding rows from HBM and add positions.

    tok_ref : SMEM (B * T_pad,) int32   -- scalar-prefetched, flattened token ids
    emb_hbm : HBM  (V, E)               -- full embedding table (pl.ANY)
    pos_ref : VMEM (T_pad, E)           -- whole position table, VMEM-resident
    out_ref : VMEM (1, chunk, E)        -- output block for (batch b, token-chunk tc)
    row_buf : VMEM (2, chunk, E)        -- double-buffered gather landing buffers
    sems    : DMA semaphores (2,)       -- one per slot, shared by that slot's rows
    """
    b = pl.program_id(0)
    tc = pl.program_id(1)
    n_tc = pl.num_programs(1)
    chunk = row_buf.shape[1]
    T_pad = n_tc * chunk
    V = emb_hbm.shape[0]
    unroll = True if chunk <= 32 else 8

    def start_gathers(chunk_idx, slot):
        base = b * T_pad + chunk_idx * chunk

        def body(r, carry):
            # Clamp out-of-range ids (PyTorch nn.Embedding would raise; clamping
            # keeps the DMA in bounds for any input).
            tok = jnp.clip(tok_ref[base + r], 0, V - 1)
            pltpu.make_async_copy(
                emb_hbm.at[pl.ds(tok, 1), :],
                row_buf.at[slot, pl.ds(r, 1), :],
                sems.at[slot],
            ).start()
            return carry

        jax.lax.fori_loop(0, chunk, body, 0, unroll=unroll)

    cur = tc % 2

    # Prime the pipeline at the first chunk of each batch row.
    @pl.when(tc == 0)
    def _():
        start_gathers(0, 0)

    # Prefetch the next chunk (same batch) into the other slot *before* waiting on
    # the current one: its token ids are read from SMEM ahead of the wait and the
    # gathers overlap with this step's add and output writeback.
    @pl.when(tc + 1 < n_tc)
    def _():
        start_gathers(tc + 1, 1 - cur)

    # Wait for the current chunk's row gathers (one wait per issued row copy; all
    # copies of a slot share one semaphore and have identical (1, E) shapes).
    def wait_body(r, carry):
        pltpu.make_async_copy(
            emb_hbm.at[pl.ds(0, 1), :],
            row_buf.at[cur, pl.ds(r, 1), :],
            sems.at[cur],
        ).wait()
        return carry

    jax.lax.fori_loop(0, chunk, wait_body, 0, unroll=unroll)

    # Fused add against the VMEM-resident position slice; one dense store.
    off = pl.multiple_of(tc * chunk, chunk)
    pos = pos_ref[pl.ds(off, chunk), :]
    out_ref[0] = (row_buf[cur] + pos).astype(out_ref.dtype)


def clip_embedding(tokens, token_emb, pos_emb, *, max_chunk=128):
    """tokens: (B, T) int; token_emb: (V, E); pos_emb: (T, E) -> (B, T, E)."""
    B, T = tokens.shape
    V, E = token_emb.shape
    assert pos_emb.shape == (T, E)

    dtype = token_emb.dtype
    itemsize = jnp.dtype(dtype).itemsize
    # Sublane-full tiles per dtype: 8 rows for 4-byte, 16 for 2-byte, 32 for 1-byte.
    row_align = {4: 8, 2: 16, 1: 32}.get(itemsize, 8)
    max_chunk = _round_up(max_chunk, row_align)

    # Large dtype-aligned chunks: whole (padded) T when it fits, else max_chunk rows.
    chunk = min(_round_up(T, row_align), max_chunk)
    T_pad = _round_up(T, chunk)
    n_tc = T_pad // chunk

    # Pad tokens / positions so every tile is full; padded rows are sliced off below.
    tok = jnp.zeros((B, T_pad), jnp.int32).at[:, :T].set(tokens.astype(jnp.int32))
    tok_flat = tok.reshape(-1)
    pos = pos_emb.astype(dtype)
    if T_pad != T:
        pos = jnp.zeros((T_pad, E), dtype).at[:T, :].set(pos)

    cost = pl.CostEstimate(
        flops=B * T_pad * E,
        transcendentals=0,
        bytes_accessed=(2 * B * T_pad * E + T_pad * E) * itemsize,
    )

    out = pl.pallas_call(
        clip_embedding_kernel,
        out_shape=jax.ShapeDtypeStruct((B, T_pad, E), dtype),
        grid_spec=pltpu.PrefetchScalarGridSpec(
            num_scalar_prefetch=1,  # flattened tokens -> SMEM
            grid=(B, n_tc),
            in_specs=[
                pl.BlockSpec(memory_space=pl.ANY),                     # table in HBM
                pl.BlockSpec((T_pad, E), lambda b, tc, tok: (0, 0)),   # pos table, fetched once
            ],
            out_specs=pl.BlockSpec((1, chunk, E), lambda b, tc, tok: (b, tc, 0)),
            scratch_shapes=[
                pltpu.VMEM((2, chunk, E), dtype),      # double-buffered gather buffers
                pltpu.SemaphoreType.DMA((2,)),         # one DMA semaphore per slot
            ],
        ),
        compiler_params=pltpu.CompilerParams(
            # Batch axis parallel (keeps both v7x TCs busy when B >= 2); the chunk
            # axis carries the cross-step gather prefetch, so it must be arbitrary.
            dimension_semantics=("parallel", "arbitrary"),
        ),
        cost_estimate=cost,
    )(tok_flat, token_emb, pos)

    return out[:, :T, :] if T_pad != T else out


if __name__ == "__main__":
    # Small shapes consistent with the module: n_vocab=64, n_embd=128, n_token=8, batch=2.
    n_vocab, n_embd, n_token, batch = 64, 128, 8, 2

    key = jax.random.PRNGKey(0)
    k_tok, k_emb, k_pos = jax.random.split(key, 3)

    tokens = jax.random.randint(k_tok, (batch, n_token), 0, n_vocab, dtype=jnp.int32)
    # nn.Embedding init ~ N(0, 1); position_embedding is zeros in __init__, but use
    # small non-zero values so the add path is actually exercised.
    token_emb = jax.random.normal(k_emb, (n_vocab, n_embd), dtype=jnp.float32)
    pos_emb = 0.02 * jax.random.normal(k_pos, (n_token, n_embd), dtype=jnp.float32)

    out = jax.block_until_ready(clip_embedding(tokens, token_emb, pos_emb))

    # Pure-JAX reference: x = token_embedding(tokens); x += position_embedding
    ref = jnp.take(token_emb, tokens, axis=0) + pos_emb[None, :, :]

    assert out.shape == (batch, n_token, n_embd)
    assert jnp.allclose(out, ref, atol=1e-6, rtol=1e-6)
    print("KERNEL_OK")
</pallas_src>

<mosaic_0001>
module attributes {stable_mosaic.version = 11 : i64} {
  func.func @clip_embedding_kernel(%arg0: i32, %arg1: i32, %arg2: memref<16xi32, #tpu.memory_space<smem>>, %arg3: memref<64x128xf32, #tpu.memory_space<any>>, %arg4: memref<8x128xf32, #tpu.memory_space<vmem>>, %arg5: memref<1x8x128xf32, #tpu.memory_space<vmem>>, %arg6: memref<2x8x128xf32, #tpu.memory_space<vmem>>, %arg7: memref<2x!tpu.dma_semaphore, #tpu.memory_space<semaphore_mem>>) attributes {dimension_semantics = [#tpu.dimension_semantics<parallel>, #tpu.dimension_semantics<arbitrary>], iteration_bounds = array<i64: 2, 1>, scalar_prefetch = 1 : i64, scratch_operands = 2 : i64, tpu.core_type = #tpu.core_type<tc>, window_params = [{}, {pipeline_mode = #tpu.pipeline_mode<synchronous>, transform_indices = @transform_1, window_bounds = array<i64: 8, 128>}, {transform_indices = @transform_2, window_bounds = array<i64: 1, 8, 128>}]} {
    %c2_i32 = arith.constant 2 : i32
    %c0_i32 = arith.constant 0 : i32
    %0 = arith.cmpi eq, %c2_i32, %c0_i32 : i32
    %c1_i32 = arith.constant 1 : i32
    %1 = arith.select %0, %c1_i32, %c2_i32 : i32
    %2 = arith.remsi %arg1, %1 : i32
    %c0_i32_0 = arith.constant 0 : i32
    %3 = arith.cmpi ne, %2, %c0_i32_0 : i32
    %c0_i32_1 = arith.constant 0 : i32
    %4 = arith.cmpi slt, %2, %c0_i32_1 : i32
    %c0_i32_2 = arith.constant 0 : i32
    %5 = arith.cmpi slt, %1, %c0_i32_2 : i32
    %6 = arith.xori %4, %5 : i1
    %7 = arith.andi %6, %3 : i1
    %8 = arith.addi %2, %1 : i32
    %9 = arith.select %7, %8, %2 : i32
    %c0_i32_3 = arith.constant 0 : i32
    %10 = arith.cmpi eq, %arg1, %c0_i32_3 : i32
    %11 = arith.extui %10 : i1 to i32
    %c0_i32_4 = arith.constant 0 : i32
    %12 = arith.cmpi ne, %11, %c0_i32_4 : i32
    scf.if %12 {
      %c8_i32_41 = arith.constant 8 : i32
      %68 = arith.muli %arg0, %c8_i32_41 : i32
      %c0_i32_42 = arith.constant 0 : i32
      %69 = arith.addi %68, %c0_i32_42 : i32
      %c0_i32_43 = arith.constant 0 : i32
      %70 = arith.addi %69, %c0_i32_43 : i32
      %71 = arith.index_cast %70 : i32 to index
      %72 = memref.load %arg2[%71] : memref<16xi32, #tpu.memory_space<smem>>
      %c0_i32_44 = arith.constant 0 : i32
      %c63_i32 = arith.constant 63 : i32
      %73 = arith.maxsi %c0_i32_44, %72 : i32
      %74 = arith.minsi %c63_i32, %73 : i32
      %c0_i32_45 = arith.constant 0 : i32
      %c0_i32_46 = arith.constant 0 : i32
      %c0_i32_47 = arith.constant 0 : i32
      %75 = tpu.memref_slice %arg3[%74, %c0_i32_47] : memref<64x128xf32, #tpu.memory_space<any>> -> memref<1x128xf32, #tpu.memory_space<any>>
      %c0_i32_48 = arith.constant 0 : i32
      %76 = tpu.memref_slice %arg6[%c0_i32_45, %c0_i32_43, %c0_i32_48] : memref<2x8x128xf32, #tpu.memory_space<vmem>> -> memref<1x1x128xf32, #tpu.memory_space<vmem>>
      %77 = tpu.memref_squeeze %76 : memref<1x1x128xf32, #tpu.memory_space<vmem>> -> memref<1x128xf32, #tpu.memory_space<vmem>>
      %78 = tpu.memref_slice %arg7[%c0_i32_46] : memref<2x!tpu.dma_semaphore, #tpu.memory_space<semaphore_mem>> -> memref<1x!tpu.dma_semaphore, #tpu.memory_space<semaphore_mem>>
      %79 = tpu.memref_squeeze %78 : memref<1x!tpu.dma_semaphore, #tpu.memory_space<semaphore_mem>> -> memref<!tpu.dma_semaphore, #tpu.memory_space<semaphore_mem>>
      tpu.enqueue_dma source(%75 : memref<1x128xf32, #tpu.memory_space<any>>) target(%77 : memref<1x128xf32, #tpu.memory_space<vmem>>) target_semaphore(%79 : memref<!tpu.dma_semaphore, #tpu.memory_space<semaphore_mem>>)
      %c1_i32_49 = arith.constant 1 : i32
      %80 = arith.addi %69, %c1_i32_49 : i32
      %81 = arith.index_cast %80 : i32 to index
      %82 = memref.load %arg2[%81] : memref<16xi32, #tpu.memory_space<smem>>
      %c0_i32_50 = arith.constant 0 : i32
      %c63_i32_51 = arith.constant 63 : i32
      %83 = arith.maxsi %c0_i32_50, %82 : i32
      %84 = arith.minsi %c63_i32_51, %83 : i32
      %c0_i32_52 = arith.constant 0 : i32
      %c0_i32_53 = arith.constant 0 : i32
      %c0_i32_54 = arith.constant 0 : i32
      %85 = tpu.memref_slice %arg3[%84, %c0_i32_54] : memref<64x128xf32, #tpu.memory_space<any>> -> memref<1x128xf32, #tpu.memory_space<any>>
      %c0_i32_55 = arith.constant 0 : i32
      %86 = tpu.memref_slice %arg6[%c0_i32_52, %c1_i32_49, %c0_i32_55] : memref<2x8x128xf32, #tpu.memory_space<vmem>> -> memref<1x1x128xf32, #tpu.memory_space<vmem>>
      %87 = tpu.memref_squeeze %86 : memref<1x1x128xf32, #tpu.memory_space<vmem>> -> memref<1x128xf32, #tpu.memory_space<vmem>>
      %88 = tpu.memref_slice %arg7[%c0_i32_53] : memref<2x!tpu.dma_semaphore, #tpu.memory_space<semaphore_mem>> -> memref<1x!tpu.dma_semaphore, #tpu.memory_space<semaphore_mem>>
      %89 = tpu.memref_squeeze %88 : memref<1x!tpu.dma_semaphore, #tpu.memory_space<semaphore_mem>> -> memref<!tpu.dma_semaphore, #tpu.memory_space<semaphore_mem>>
      tpu.enqueue_dma source(%85 : memref<1x128xf32, #tpu.memory_space<any>>) target(%87 : memref<1x128xf32, #tpu.memory_space<vmem>>) target_semaphore(%89 : memref<!tpu.dma_semaphore, #tpu.memory_space<semaphore_mem>>)
      %c2_i32_56 = arith.constant 2 : i32
      %90 = arith.addi %69, %c2_i32_56 : i32
      %91 = arith.index_cast %90 : i32 to index
      %92 = memref.load %arg2[%91] : memref<16xi32, #tpu.memory_space<smem>>
      %c0_i32_57 = arith.constant 0 : i32
      %c63_i32_58 = arith.constant 63 : i32
      %93 = arith.maxsi %c0_i32_57, %92 : i32
      %94 = arith.minsi %c63_i32_58, %93 : i32
      %c0_i32_59 = arith.constant 0 : i32
      %c0_i32_60 = arith.constant 0 : i32
      %c0_i32_61 = arith.constant 0 : i32
      %95 = tpu.memref_slice %arg3[%94, %c0_i32_61] : memref<64x128xf32, #tpu.memory_space<any>> -> memref<1x128xf32, #tpu.memory_space<any>>
      %c0_i32_62 = arith.constant 0 : i32
      %96 = tpu.memref_slice %arg6[%c0_i32_59, %c2_i32_56, %c0_i32_62] : memref<2x8x128xf32, #tpu.memory_space<vmem>> -> memref<1x1x128xf32, #tpu.memory_space<vmem>>
      %97 = tpu.memref_squeeze %96 : memref<1x1x128xf32, #tpu.memory_space<vmem>> -> memref<1x128xf32, #tpu.memory_space<vmem>>
      %98 = tpu.memref_slice %arg7[%c0_i32_60] : memref<2x!tpu.dma_semaphore, #tpu.memory_space<semaphore_mem>> -> memref<1x!tpu.dma_semaphore, #tpu.memory_space<semaphore_mem>>
      %99 = tpu.memref_squeeze %98 : memref<1x!tpu.dma_semaphore, #tpu.memory_space<semaphore_mem>> -> memref<!tpu.dma_semaphore, #tpu.memory_space<semaphore_mem>>
      tpu.enqueue_dma source(%95 : memref<1x128xf32, #tpu.memory_space<any>>) target(%97 : memref<1x128xf32, #tpu.memory_space<vmem>>) target_semaphore(%99 : memref<!tpu.dma_semaphore, #tpu.memory_space<semaphore_mem>>)
      %c3_i32_63 = arith.constant 3 : i32
      %100 = arith.addi %69, %c3_i32_63 : i32
      %101 = arith.index_cast %100 : i32 to index
      %102 = memref.load %arg2[%101] : memref<16xi32, #tpu.memory_space<smem>>
      %c0_i32_64 = arith.constant 0 : i32
      %c63_i32_65 = arith.constant 63 : i32
      %103 = arith.maxsi %c0_i32_64, %102 : i32
      %104 = arith.minsi %c63_i32_65, %103 : i32
      %c0_i32_66 = arith.constant 0 : i32
      %c0_i32_67 = arith.constant 0 : i32
      %c0_i32_68 = arith.constant 0 : i32
      %105 = tpu.memref_slice %arg3[%104, %c0_i32_68] : memref<64x128xf32, #tpu.memory_space<any>> -> memref<1x128xf32, #tpu.memory_space<any>>
      %c0_i32_69 = arith.constant 0 : i32
      %106 = tpu.memref_slice %arg6[%c0_i32_66, %c3_i32_63, %c0_i32_69] : memref<2x8x128xf32, #tpu.memory_space<vmem>> -> memref<1x1x128xf32, #tpu.memory_space<vmem>>
      %107 = tpu.memref_squeeze %106 : memref<1x1x128xf32, #tpu.memory_space<vmem>> -> memref<1x128xf32, #tpu.memory_space<vmem>>
      %108 = tpu.memref_slice %arg7[%c0_i32_67] : memref<2x!tpu.dma_semaphore, #tpu.memory_space<semaphore_mem>> -> memref<1x!tpu.dma_semaphore, #tpu.memory_space<semaphore_mem>>
      %109 = tpu.memref_squeeze %108 : memref<1x!tpu.dma_semaphore, #tpu.memory_space<semaphore_mem>> -> memref<!tpu.dma_semaphore, #tpu.memory_space<semaphore_mem>>
      tpu.enqueue_dma source(%105 : memref<1x128xf32, #tpu.memory_space<any>>) target(%107 : memref<1x128xf32, #tpu.memory_space<vmem>>) target_semaphore(%109 : memref<!tpu.dma_semaphore, #tpu.memory_space<semaphore_mem>>)
      %c4_i32_70 = arith.constant 4 : i32
      %110 = arith.addi %69, %c4_i32_70 : i32
      %111 = arith.index_cast %110 : i32 to index
      %112 = memref.load %arg2[%111] : memref<16xi32, #tpu.memory_space<smem>>
      %c0_i32_71 = arith.constant 0 : i32
      %c63_i32_72 = arith.constant 63 : i32
      %113 = arith.maxsi %c0_i32_71, %112 : i32
      %114 = arith.minsi %c63_i32_72, %113 : i32
      %c0_i32_73 = arith.constant 0 : i32
      %c0_i32_74 = arith.constant 0 : i32
      %c0_i32_75 = arith.constant 0 : i32
      %115 = tpu.memref_slice %arg3[%114, %c0_i32_75] : memref<64x128xf32, #tpu.memory_space<any>> -> memref<1x128xf32, #tpu.memory_space<any>>
      %c0_i32_76 = arith.constant 0 : i32
      %116 = tpu.memref_slice %arg6[%c0_i32_73, %c4_i32_70, %c0_i32_76] : memref<2x8x128xf32, #tpu.memory_space<vmem>> -> memref<1x1x128xf32, #tpu.memory_space<vmem>>
      %117 = tpu.memref_squeeze %116 : memref<1x1x128xf32, #tpu.memory_space<vmem>> -> memref<1x128xf32, #tpu.memory_space<vmem>>
      %118 = tpu.memref_slice %arg7[%c0_i32_74] : memref<2x!tpu.dma_semaphore, #tpu.memory_space<semaphore_mem>> -> memref<1x!tpu.dma_semaphore, #tpu.memory_space<semaphore_mem>>
      %119 = tpu.memref_squeeze %118 : memref<1x!tpu.dma_semaphore, #tpu.memory_space<semaphore_mem>> -> memref<!tpu.dma_semaphore, #tpu.memory_space<semaphore_mem>>
      tpu.enqueue_dma source(%115 : memref<1x128xf32, #tpu.memory_space<any>>) target(%117 : memref<1x128xf32, #tpu.memory_space<vmem>>) target_semaphore(%119 : memref<!tpu.dma_semaphore, #tpu.memory_space<semaphore_mem>>)
      %c5_i32_77 = arith.constant 5 : i32
      %120 = arith.addi %69, %c5_i32_77 : i32
      %121 = arith.index_cast %120 : i32 to index
      %122 = memref.load %arg2[%121] : memref<16xi32, #tpu.memory_space<smem>>
      %c0_i32_78 = arith.constant 0 : i32
      %c63_i32_79 = arith.constant 63 : i32
      %123 = arith.maxsi %c0_i32_78, %122 : i32
      %124 = arith.minsi %c63_i32_79, %123 : i32
      %c0_i32_80 = arith.constant 0 : i32
      %c0_i32_81 = arith.constant 0 : i32
      %c0_i32_82 = arith.constant 0 : i32
      %125 = tpu.memref_slice %arg3[%124, %c0_i32_82] : memref<64x128xf32, #tpu.memory_space<any>> -> memref<1x128xf32, #tpu.memory_space<any>>
      %c0_i32_83 = arith.constant 0 : i32
      %126 = tpu.memref_slice %arg6[%c0_i32_80, %c5_i32_77, %c0_i32_83] : memref<2x8x128xf32, #tpu.memory_space<vmem>> -> memref<1x1x128xf32, #tpu.memory_space<vmem>>
      %127 = tpu.memref_squeeze %126 : memref<1x1x128xf32, #tpu.memory_space<vmem>> -> memref<1x128xf32, #tpu.memory_space<vmem>>
      %128 = tpu.memref_slice %arg7[%c0_i32_81] : memref<2x!tpu.dma_semaphore, #tpu.memory_space<semaphore_mem>> -> memref<1x!tpu.dma_semaphore, #tpu.memory_space<semaphore_mem>>
      %129 = tpu.memref_squeeze %128 : memref<1x!tpu.dma_semaphore, #tpu.memory_space<semaphore_mem>> -> memref<!tpu.dma_semaphore, #tpu.memory_space<semaphore_mem>>
      tpu.enqueue_dma source(%125 : memref<1x128xf32, #tpu.memory_space<any>>) target(%127 : memref<1x128xf32, #tpu.memory_space<vmem>>) target_semaphore(%129 : memref<!tpu.dma_semaphore, #tpu.memory_space<semaphore_mem>>)
      %c6_i32_84 = arith.constant 6 : i32
      %130 = arith.addi %69, %c6_i32_84 : i32
      %131 = arith.index_cast %130 : i32 to index
      %132 = memref.load %arg2[%131] : memref<16xi32, #tpu.memory_space<smem>>
      %c0_i32_85 = arith.constant 0 : i32
      %c63_i32_86 = arith.constant 63 : i32
      %133 = arith.maxsi %c0_i32_85, %132 : i32
      %134 = arith.minsi %c63_i32_86, %133 : i32
      %c0_i32_87 = arith.constant 0 : i32
      %c0_i32_88 = arith.constant 0 : i32
      %c0_i32_89 = arith.constant 0 : i32
      %135 = tpu.memref_slice %arg3[%134, %c0_i32_89] : memref<64x128xf32, #tpu.memory_space<any>> -> memref<1x128xf32, #tpu.memory_space<any>>
      %c0_i32_90 = arith.constant 0 : i32
      %136 = tpu.memref_slice %arg6[%c0_i32_87, %c6_i32_84, %c0_i32_90] : memref<2x8x128xf32, #tpu.memory_space<vmem>> -> memref<1x1x128xf32, #tpu.memory_space<vmem>>
      %137 = tpu.memref_squeeze %136 : memref<1x1x128xf32, #tpu.memory_space<vmem>> -> memref<1x128xf32, #tpu.memory_space<vmem>>
      %138 = tpu.memref_slice %arg7[%c0_i32_88] : memref<2x!tpu.dma_semaphore, #tpu.memory_space<semaphore_mem>> -> memref<1x!tpu.dma_semaphore, #tpu.memory_space<semaphore_mem>>
      %139 = tpu.memref_squeeze %138 : memref<1x!tpu.dma_semaphore, #tpu.memory_space<semaphore_mem>> -> memref<!tpu.dma_semaphore, #tpu.memory_space<semaphore_mem>>
      tpu.enqueue_dma source(%135 : memref<1x128xf32, #tpu.memory_space<any>>) target(%137 : memref<1x128xf32, #tpu.memory_space<vmem>>) target_semaphore(%139 : memref<!tpu.dma_semaphore, #tpu.memory_space<semaphore_mem>>)
      %c7_i32_91 = arith.constant 7 : i32
      %140 = arith.addi %69, %c7_i32_91 : i32
      %141 = arith.index_cast %140 : i32 to index
      %142 = memref.load %arg2[%141] : memref<16xi32, #tpu.memory_space<smem>>
      %c0_i32_92 = arith.constant 0 : i32
      %c63_i32_93 = arith.constant 63 : i32
      %143 = arith.maxsi %c0_i32_92, %142 : i32
      %144 = arith.minsi %c63_i32_93, %143 : i32
      %c0_i32_94 = arith.constant 0 : i32
      %c0_i32_95 = arith.constant 0 : i32
      %c0_i32_96 = arith.constant 0 : i32
      %145 = tpu.memref_slice %arg3[%144, %c0_i32_96] : memref<64x128xf32, #tpu.memory_space<any>> -> memref<1x128xf32, #tpu.memory_space<any>>
      %c0_i32_97 = arith.constant 0 : i32
      %146 = tpu.memref_slice %arg6[%c0_i32_94, %c7_i32_91, %c0_i32_97] : memref<2x8x128xf32, #tpu.memory_space<vmem>> -> memref<1x1x128xf32, #tpu.memory_space<vmem>>
      %147 = tpu.memref_squeeze %146 : memref<1x1x128xf32, #tpu.memory_space<vmem>> -> memref<1x128xf32, #tpu.memory_space<vmem>>
      %148 = tpu.memref_slice %arg7[%c0_i32_95] : memref<2x!tpu.dma_semaphore, #tpu.memory_space<semaphore_mem>> -> memref<1x!tpu.dma_semaphore, #tpu.memory_space<semaphore_mem>>
      %149 = tpu.memref_squeeze %148 : memref<1x!tpu.dma_semaphore, #tpu.memory_space<semaphore_mem>> -> memref<!tpu.dma_semaphore, #tpu.memory_space<semaphore_mem>>
      tpu.enqueue_dma source(%145 : memref<1x128xf32, #tpu.memory_space<any>>) target(%147 : memref<1x128xf32, #tpu.memory_space<vmem>>) target_semaphore(%149 : memref<!tpu.dma_semaphore, #tpu.memory_space<semaphore_mem>>)
      %c8_i32_98 = arith.constant 8 : i32
    } else {
    }
    %c1_i32_5 = arith.constant 1 : i32
    %13 = arith.addi %arg1, %c1_i32_5 : i32
    %c1_i32_6 = arith.constant 1 : i32
    %14 = arith.cmpi slt, %13, %c1_i32_6 : i32
    %15 = arith.extui %14 : i1 to i32
    %c0_i32_7 = arith.constant 0 : i32
    %16 = arith.cmpi ne, %15, %c0_i32_7 : i32
    scf.if %16 {
      %c1_i32_41 = arith.constant 1 : i32
      %68 = arith.addi %arg1, %c1_i32_41 : i32
      %c1_i32_42 = arith.constant 1 : i32
      %69 = arith.subi %c1_i32_42, %9 : i32
      %c8_i32_43 = arith.constant 8 : i32
      %70 = arith.muli %arg0, %c8_i32_43 : i32
      %c8_i32_44 = arith.constant 8 : i32
      %71 = arith.muli %68, %c8_i32_44 : i32
      %72 = arith.addi %70, %71 : i32
      %c0_i32_45 = arith.constant 0 : i32
      %73 = arith.addi %72, %c0_i32_45 : i32
      %74 = arith.index_cast %73 : i32 to index
      %75 = memref.load %arg2[%74] : memref<16xi32, #tpu.memory_space<smem>>
      %c0_i32_46 = arith.constant 0 : i32
      %c63_i32 = arith.constant 63 : i32
      %76 = arith.maxsi %c0_i32_46, %75 : i32
      %77 = arith.minsi %c63_i32, %76 : i32
      %c0_i32_47 = arith.constant 0 : i32
      %78 = tpu.memref_slice %arg3[%77, %c0_i32_47] : memref<64x128xf32, #tpu.memory_space<any>> -> memref<1x128xf32, #tpu.memory_space<any>>
      %c0_i32_48 = arith.constant 0 : i32
      %79 = tpu.memref_slice %arg6[%69, %c0_i32_45, %c0_i32_48] : memref<2x8x128xf32, #tpu.memory_space<vmem>> -> memref<1x1x128xf32, #tpu.memory_space<vmem>>
      %80 = tpu.memref_squeeze %79 : memref<1x1x128xf32, #tpu.memory_space<vmem>> -> memref<1x128xf32, #tpu.memory_space<vmem>>
      %81 = tpu.memref_slice %arg7[%69] : memref<2x!tpu.dma_semaphore, #tpu.memory_space<semaphore_mem>> -> memref<1x!tpu.dma_semaphore, #tpu.memory_space<semaphore_mem>>
      %82 = tpu.memref_squeeze %81 : memref<1x!tpu.dma_semaphore, #tpu.memory_space<semaphore_mem>> -> memref<!tpu.dma_semaphore, #tpu.memory_space<semaphore_mem>>
      tpu.enqueue_dma source(%78 : memref<1x128xf32, #tpu.memory_space<any>>) target(%80 : memref<1x128xf32, #tpu.memory_space<vmem>>) target_semaphore(%82 : memref<!tpu.dma_semaphore, #tpu.memory_space<semaphore_mem>>)
      %c1_i32_49 = arith.constant 1 : i32
      %83 = arith.addi %72, %c1_i32_49 : i32
      %84 = arith.index_cast %83 : i32 to index
      %85 = memref.load %arg2[%84] : memref<16xi32, #tpu.memory_space<smem>>
      %c0_i32_50 = arith.constant 0 : i32
      %c63_i32_51 = arith.constant 63 : i32
      %86 = arith.maxsi %c0_i32_50, %85 : i32
      %87 = arith.minsi %c63_i32_51, %86 : i32
      %c0_i32_52 = arith.constant 0 : i32
      %88 = tpu.memref_slice %arg3[%87, %c0_i32_52] : memref<64x128xf32, #tpu.memory_space<any>> -> memref<1x128xf32, #tpu.memory_space<any>>
      %c0_i32_53 = arith.constant 0 : i32
      %89 = tpu.memref_slice %arg6[%69, %c1_i32_49, %c0_i32_53] : memref<2x8x128xf32, #tpu.memory_space<vmem>> -> memref<1x1x128xf32, #tpu.memory_space<vmem>>
      %90 = tpu.memref_squeeze %89 : memref<1x1x128xf32, #tpu.memory_space<vmem>> -> memref<1x128xf32, #tpu.memory_space<vmem>>
      %91 = tpu.memref_slice %arg7[%69] : memref<2x!tpu.dma_semaphore, #tpu.memory_space<semaphore_mem>> -> memref<1x!tpu.dma_semaphore, #tpu.memory_space<semaphore_mem>>
      %92 = tpu.memref_squeeze %91 : memref<1x!tpu.dma_semaphore, #tpu.memory_space<semaphore_mem>> -> memref<!tpu.dma_semaphore, #tpu.memory_space<semaphore_mem>>
      tpu.enqueue_dma source(%88 : memref<1x128xf32, #tpu.memory_space<any>>) target(%90 : memref<1x128xf32, #tpu.memory_space<vmem>>) target_semaphore(%92 : memref<!tpu.dma_semaphore, #tpu.memory_space<semaphore_mem>>)
      %c2_i32_54 = arith.constant 2 : i32
      %93 = arith.addi %72, %c2_i32_54 : i32
      %94 = arith.index_cast %93 : i32 to index
      %95 = memref.load %arg2[%94] : memref<16xi32, #tpu.memory_space<smem>>
      %c0_i32_55 = arith.constant 0 : i32
      %c63_i32_56 = arith.constant 63 : i32
      %96 = arith.maxsi %c0_i32_55, %95 : i32
      %97 = arith.minsi %c63_i32_56, %96 : i32
      %c0_i32_57 = arith.constant 0 : i32
      %98 = tpu.memref_slice %arg3[%97, %c0_i32_57] : memref<64x128xf32, #tpu.memory_space<any>> -> memref<1x128xf32, #tpu.memory_space<any>>
      %c0_i32_58 = arith.constant 0 : i32
      %99 = tpu.memref_slice %arg6[%69, %c2_i32_54, %c0_i32_58] : memref<2x8x128xf32, #tpu.memory_space<vmem>> -> memref<1x1x128xf32, #tpu.memory_space<vmem>>
      %100 = tpu.memref_squeeze %99 : memref<1x1x128xf32, #tpu.memory_space<vmem>> -> memref<1x128xf32, #tpu.memory_space<vmem>>
      %101 = tpu.memref_slice %arg7[%69] : memref<2x!tpu.dma_semaphore, #tpu.memory_space<semaphore_mem>> -> memref<1x!tpu.dma_semaphore, #tpu.memory_space<semaphore_mem>>
      %102 = tpu.memref_squeeze %101 : memref<1x!tpu.dma_semaphore, #tpu.memory_space<semaphore_mem>> -> memref<!tpu.dma_semaphore, #tpu.memory_space<semaphore_mem>>
      tpu.enqueue_dma source(%98 : memref<1x128xf32, #tpu.memory_space<any>>) target(%100 : memref<1x128xf32, #tpu.memory_space<vmem>>) target_semaphore(%102 : memref<!tpu.dma_semaphore, #tpu.memory_space<semaphore_mem>>)
      %c3_i32_59 = arith.constant 3 : i32
      %103 = arith.addi %72, %c3_i32_59 : i32
      %104 = arith.index_cast %103 : i32 to index
      %105 = memref.load %arg2[%104] : memref<16xi32, #tpu.memory_space<smem>>
      %c0_i32_60 = arith.constant 0 : i32
      %c63_i32_61 = arith.constant 63 : i32
      %106 = arith.maxsi %c0_i32_60, %105 : i32
      %107 = arith.minsi %c63_i32_61, %106 : i32
      %c0_i32_62 = arith.constant 0 : i32
      %108 = tpu.memref_slice %arg3[%107, %c0_i32_62] : memref<64x128xf32, #tpu.memory_space<any>> -> memref<1x128xf32, #tpu.memory_space<any>>
      %c0_i32_63 = arith.constant 0 : i32
      %109 = tpu.memref_slice %arg6[%69, %c3_i32_59, %c0_i32_63] : memref<2x8x128xf32, #tpu.memory_space<vmem>> -> memref<1x1x128xf32, #tpu.memory_space<vmem>>
      %110 = tpu.memref_squeeze %109 : memref<1x1x128xf32, #tpu.memory_space<vmem>> -> memref<1x128xf32, #tpu.memory_space<vmem>>
      %111 = tpu.memref_slice %arg7[%69] : memref<2x!tpu.dma_semaphore, #tpu.memory_space<semaphore_mem>> -> memref<1x!tpu.dma_semaphore, #tpu.memory_space<semaphore_mem>>
      %112 = tpu.memref_squeeze %111 : memref<1x!tpu.dma_semaphore, #tpu.memory_space<semaphore_mem>> -> memref<!tpu.dma_semaphore, #tpu.memory_space<semaphore_mem>>
      tpu.enqueue_dma source(%108 : memref<1x128xf32, #tpu.memory_space<any>>) target(%110 : memref<1x128xf32, #tpu.memory_space<vmem>>) target_semaphore(%112 : memref<!tpu.dma_semaphore, #tpu.memory_space<semaphore_mem>>)
      %c4_i32_64 = arith.constant 4 : i32
      %113 = arith.addi %72, %c4_i32_64 : i32
      %114 = arith.index_cast %113 : i32 to index
      %115 = memref.load %arg2[%114] : memref<16xi32, #tpu.memory_space<smem>>
      %c0_i32_65 = arith.constant 0 : i32
      %c63_i32_66 = arith.constant 63 : i32
      %116 = arith.maxsi %c0_i32_65, %115 : i32
      %117 = arith.minsi %c63_i32_66, %116 : i32
      %c0_i32_67 = arith.constant 0 : i32
      %118 = tpu.memref_slice %arg3[%117, %c0_i32_67] : memref<64x128xf32, #tpu.memory_space<any>> -> memref<1x128xf32, #tpu.memory_space<any>>
      %c0_i32_68 = arith.constant 0 : i32
      %119 = tpu.memref_slice %arg6[%69, %c4_i32_64, %c0_i32_68] : memref<2x8x128xf32, #tpu.memory_space<vmem>> -> memref<1x1x128xf32, #tpu.memory_space<vmem>>
      %120 = tpu.memref_squeeze %119 : memref<1x1x128xf32, #tpu.memory_space<vmem>> -> memref<1x128xf32, #tpu.memory_space<vmem>>
      %121 = tpu.memref_slice %arg7[%69] : memref<2x!tpu.dma_semaphore, #tpu.memory_space<semaphore_mem>> -> memref<1x!tpu.dma_semaphore, #tpu.memory_space<semaphore_mem>>
      %122 = tpu.memref_squeeze %121 : memref<1x!tpu.dma_semaphore, #tpu.memory_space<semaphore_mem>> -> memref<!tpu.dma_semaphore, #tpu.memory_space<semaphore_mem>>
      tpu.enqueue_dma source(%118 : memref<1x128xf32, #tpu.memory_space<any>>) target(%120 : memref<1x128xf32, #tpu.memory_space<vmem>>) target_semaphore(%122 : memref<!tpu.dma_semaphore, #tpu.memory_space<semaphore_mem>>)
      %c5_i32_69 = arith.constant 5 : i32
      %123 = arith.addi %72, %c5_i32_69 : i32
      %124 = arith.index_cast %123 : i32 to index
      %125 = memref.load %arg2[%124] : memref<16xi32, #tpu.memory_space<smem>>
      %c0_i32_70 = arith.constant 0 : i32
      %c63_i32_71 = arith.constant 63 : i32
      %126 = arith.maxsi %c0_i32_70, %125 : i32
      %127 = arith.minsi %c63_i32_71, %126 : i32
      %c0_i32_72 = arith.constant 0 : i32
      %128 = tpu.memref_slice %arg3[%127, %c0_i32_72] : memref<64x128xf32, #tpu.memory_space<any>> -> memref<1x128xf32, #tpu.memory_space<any>>
      %c0_i32_73 = arith.constant 0 : i32
      %129 = tpu.memref_slice %arg6[%69, %c5_i32_69, %c0_i32_73] : memref<2x8x128xf32, #tpu.memory_space<vmem>> -> memref<1x1x128xf32, #tpu.memory_space<vmem>>
      %130 = tpu.memref_squeeze %129 : memref<1x1x128xf32, #tpu.memory_space<vmem>> -> memref<1x128xf32, #tpu.memory_space<vmem>>
      %131 = tpu.memref_slice %arg7[%69] : memref<2x!tpu.dma_semaphore, #tpu.memory_space<semaphore_mem>> -> memref<1x!tpu.dma_semaphore, #tpu.memory_space<semaphore_mem>>
      %132 = tpu.memref_squeeze %131 : memref<1x!tpu.dma_semaphore, #tpu.memory_space<semaphore_mem>> -> memref<!tpu.dma_semaphore, #tpu.memory_space<semaphore_mem>>
      tpu.enqueue_dma source(%128 : memref<1x128xf32, #tpu.memory_space<any>>) target(%130 : memref<1x128xf32, #tpu.memory_space<vmem>>) target_semaphore(%132 : memref<!tpu.dma_semaphore, #tpu.memory_space<semaphore_mem>>)
      %c6_i32_74 = arith.constant 6 : i32
      %133 = arith.addi %72, %c6_i32_74 : i32
      %134 = arith.index_cast %133 : i32 to index
      %135 = memref.load %arg2[%134] : memref<16xi32, #tpu.memory_space<smem>>
      %c0_i32_75 = arith.constant 0 : i32
      %c63_i32_76 = arith.constant 63 : i32
      %136 = arith.maxsi %c0_i32_75, %135 : i32
      %137 = arith.minsi %c63_i32_76, %136 : i32
      %c0_i32_77 = arith.constant 0 : i32
      %138 = tpu.memref_slice %arg3[%137, %c0_i32_77] : memref<64x128xf32, #tpu.memory_space<any>> -> memref<1x128xf32, #tpu.memory_space<any>>
      %c0_i32_78 = arith.constant 0 : i32
      %139 = tpu.memref_slice %arg6[%69, %c6_i32_74, %c0_i32_78] : memref<2x8x128xf32, #tpu.memory_space<vmem>> -> memref<1x1x128xf32, #tpu.memory_space<vmem>>
      %140 = tpu.memref_squeeze %139 : memref<1x1x128xf32, #tpu.memory_space<vmem>> -> memref<1x128xf32, #tpu.memory_space<vmem>>
      %141 = tpu.memref_slice %arg7[%69] : memref<2x!tpu.dma_semaphore, #tpu.memory_space<semaphore_mem>> -> memref<1x!tpu.dma_semaphore, #tpu.memory_space<semaphore_mem>>
      %142 = tpu.memref_squeeze %141 : memref<1x!tpu.dma_semaphore, #tpu.memory_space<semaphore_mem>> -> memref<!tpu.dma_semaphore, #tpu.memory_space<semaphore_mem>>
      tpu.enqueue_dma source(%138 : memref<1x128xf32, #tpu.memory_space<any>>) target(%140 : memref<1x128xf32, #tpu.memory_space<vmem>>) target_semaphore(%142 : memref<!tpu.dma_semaphore, #tpu.memory_space<semaphore_mem>>)
      %c7_i32_79 = arith.constant 7 : i32
      %143 = arith.addi %72, %c7_i32_79 : i32
      %144 = arith.index_cast %143 : i32 to index
      %145 = memref.load %arg2[%144] : memref<16xi32, #tpu.memory_space<smem>>
      %c0_i32_80 = arith.constant 0 : i32
      %c63_i32_81 = arith.constant 63 : i32
      %146 = arith.maxsi %c0_i32_80, %145 : i32
      %147 = arith.minsi %c63_i32_81, %146 : i32
      %c0_i32_82 = arith.constant 0 : i32
      %148 = tpu.memref_slice %arg3[%147, %c0_i32_82] : memref<64x128xf32, #tpu.memory_space<any>> -> memref<1x128xf32, #tpu.memory_space<any>>
      %c0_i32_83 = arith.constant 0 : i32
      %149 = tpu.memref_slice %arg6[%69, %c7_i32_79, %c0_i32_83] : memref<2x8x128xf32, #tpu.memory_space<vmem>> -> memref<1x1x128xf32, #tpu.memory_space<vmem>>
      %150 = tpu.memref_squeeze %149 : memref<1x1x128xf32, #tpu.memory_space<vmem>> -> memref<1x128xf32, #tpu.memory_space<vmem>>
      %151 = tpu.memref_slice %arg7[%69] : memref<2x!tpu.dma_semaphore, #tpu.memory_space<semaphore_mem>> -> memref<1x!tpu.dma_semaphore, #tpu.memory_space<semaphore_mem>>
      %152 = tpu.memref_squeeze %151 : memref<1x!tpu.dma_semaphore, #tpu.memory_space<semaphore_mem>> -> memref<!tpu.dma_semaphore, #tpu.memory_space<semaphore_mem>>
      tpu.enqueue_dma source(%148 : memref<1x128xf32, #tpu.memory_space<any>>) target(%150 : memref<1x128xf32, #tpu.memory_space<vmem>>) target_semaphore(%152 : memref<!tpu.dma_semaphore, #tpu.memory_space<semaphore_mem>>)
      %c8_i32_84 = arith.constant 8 : i32
    } else {
    }
    %c0_i32_8 = arith.constant 0 : i32
    %c0_i32_9 = arith.constant 0 : i32
    %c0_i32_10 = arith.constant 0 : i32
    %17 = tpu.memref_slice %arg3[%c0_i32_9, %c0_i32_10] : memref<64x128xf32, #tpu.memory_space<any>> -> memref<1x128xf32, #tpu.memory_space<any>>
    %c0_i32_11 = arith.constant 0 : i32
    %18 = tpu.memref_slice %arg6[%9, %c0_i32_8, %c0_i32_11] : memref<2x8x128xf32, #tpu.memory_space<vmem>> -> memref<1x1x128xf32, #tpu.memory_space<vmem>>
    %19 = tpu.memref_squeeze %18 : memref<1x1x128xf32, #tpu.memory_space<vmem>> -> memref<1x128xf32, #tpu.memory_space<vmem>>
    %20 = tpu.memref_slice %arg7[%9] : memref<2x!tpu.dma_semaphore, #tpu.memory_space<semaphore_mem>> -> memref<1x!tpu.dma_semaphore, #tpu.memory_space<semaphore_mem>>
    %21 = tpu.memref_squeeze %20 : memref<1x!tpu.dma_semaphore, #tpu.memory_space<semaphore_mem>> -> memref<!tpu.dma_semaphore, #tpu.memory_space<semaphore_mem>>
    tpu.wait_dma2 semaphore(%21 : memref<!tpu.dma_semaphore, #tpu.memory_space<semaphore_mem>>) src(%17 : memref<1x128xf32, #tpu.memory_space<any>>) dst(%19 : memref<1x128xf32, #tpu.memory_space<vmem>>)
    %c1_i32_12 = arith.constant 1 : i32
    %c0_i32_13 = arith.constant 0 : i32
    %c0_i32_14 = arith.constant 0 : i32
    %22 = tpu.memref_slice %arg3[%c0_i32_13, %c0_i32_14] : memref<64x128xf32, #tpu.memory_space<any>> -> memref<1x128xf32, #tpu.memory_space<any>>
    %c0_i32_15 = arith.constant 0 : i32
    %23 = tpu.memref_slice %arg6[%9, %c1_i32_12, %c0_i32_15] : memref<2x8x128xf32, #tpu.memory_space<vmem>> -> memref<1x1x128xf32, #tpu.memory_space<vmem>>
    %24 = tpu.memref_squeeze %23 : memref<1x1x128xf32, #tpu.memory_space<vmem>> -> memref<1x128xf32, #tpu.memory_space<vmem>>
    %25 = tpu.memref_slice %arg7[%9] : memref<2x!tpu.dma_semaphore, #tpu.memory_space<semaphore_mem>> -> memref<1x!tpu.dma_semaphore, #tpu.memory_space<semaphore_mem>>
    %26 = tpu.memref_squeeze %25 : memref<1x!tpu.dma_semaphore, #tpu.memory_space<semaphore_mem>> -> memref<!tpu.dma_semaphore, #tpu.memory_space<semaphore_mem>>
    tpu.wait_dma2 semaphore(%26 : memref<!tpu.dma_semaphore, #tpu.memory_space<semaphore_mem>>) src(%22 : memref<1x128xf32, #tpu.memory_space<any>>) dst(%24 : memref<1x128xf32, #tpu.memory_space<vmem>>)
    %c2_i32_16 = arith.constant 2 : i32
    %c0_i32_17 = arith.constant 0 : i32
    %c0_i32_18 = arith.constant 0 : i32
    %27 = tpu.memref_slice %arg3[%c0_i32_17, %c0_i32_18] : memref<64x128xf32, #tpu.memory_space<any>> -> memref<1x128xf32, #tpu.memory_space<any>>
    %c0_i32_19 = arith.constant 0 : i32
    %28 = tpu.memref_slice %arg6[%9, %c2_i32_16, %c0_i32_19] : memref<2x8x128xf32, #tpu.memory_space<vmem>> -> memref<1x1x128xf32, #tpu.memory_space<vmem>>
    %29 = tpu.memref_squeeze %28 : memref<1x1x128xf32, #tpu.memory_space<vmem>> -> memref<1x128xf32, #tpu.memory_space<vmem>>
    %30 = tpu.memref_slice %arg7[%9] : memref<2x!tpu.dma_semaphore, #tpu.memory_space<semaphore_mem>> -> memref<1x!tpu.dma_semaphore, #tpu.memory_space<semaphore_mem>>
    %31 = tpu.memref_squeeze %30 : memref<1x!tpu.dma_semaphore, #tpu.memory_space<semaphore_mem>> -> memref<!tpu.dma_semaphore, #tpu.memory_space<semaphore_mem>>
    tpu.wait_dma2 semaphore(%31 : memref<!tpu.dma_semaphore, #tpu.memory_space<semaphore_mem>>) src(%27 : memref<1x128xf32, #tpu.memory_space<any>>) dst(%29 : memref<1x128xf32, #tpu.memory_space<vmem>>)
    %c3_i32 = arith.constant 3 : i32
    %c0_i32_20 = arith.constant 0 : i32
    %c0_i32_21 = arith.constant 0 : i32
    %32 = tpu.memref_slice %arg3[%c0_i32_20, %c0_i32_21] : memref<64x128xf32, #tpu.memory_space<any>> -> memref<1x128xf32, #tpu.memory_space<any>>
    %c0_i32_22 = arith.constant 0 : i32
    %33 = tpu.memref_slice %arg6[%9, %c3_i32, %c0_i32_22] : memref<2x8x128xf32, #tpu.memory_space<vmem>> -> memref<1x1x128xf32, #tpu.memory_space<vmem>>
    %34 = tpu.memref_squeeze %33 : memref<1x1x128xf32, #tpu.memory_space<vmem>> -> memref<1x128xf32, #tpu.memory_space<vmem>>
    %35 = tpu.memref_slice %arg7[%9] : memref<2x!tpu.dma_semaphore, #tpu.memory_space<semaphore_mem>> -> memref<1x!tpu.dma_semaphore, #tpu.memory_space<semaphore_mem>>
    %36 = tpu.memref_squeeze %35 : memref<1x!tpu.dma_semaphore, #tpu.memory_space<semaphore_mem>> -> memref<!tpu.dma_semaphore, #tpu.memory_space<semaphore_mem>>
    tpu.wait_dma2 semaphore(%36 : memref<!tpu.dma_semaphore, #tpu.memory_space<semaphore_mem>>) src(%32 : memref<1x128xf32, #tpu.memory_space<any>>) dst(%34 : memref<1x128xf32, #tpu.memory_space<vmem>>)
    %c4_i32 = arith.constant 4 : i32
    %c0_i32_23 = arith.constant 0 : i32
    %c0_i32_24 = arith.constant 0 : i32
    %37 = tpu.memref_slice %arg3[%c0_i32_23, %c0_i32_24] : memref<64x128xf32, #tpu.memory_space<any>> -> memref<1x128xf32, #tpu.memory_space<any>>
    %c0_i32_25 = arith.constant 0 : i32
    %38 = tpu.memref_slice %arg6[%9, %c4_i32, %c0_i32_25] : memref<2x8x128xf32, #tpu.memory_space<vmem>> -> memref<1x1x128xf32, #tpu.memory_space<vmem>>
    %39 = tpu.memref_squeeze %38 : memref<1x1x128xf32, #tpu.memory_space<vmem>> -> memref<1x128xf32, #tpu.memory_space<vmem>>
    %40 = tpu.memref_slice %arg7[%9] : memref<2x!tpu.dma_semaphore, #tpu.memory_space<semaphore_mem>> -> memref<1x!tpu.dma_semaphore, #tpu.memory_space<semaphore_mem>>
    %41 = tpu.memref_squeeze %40 : memref<1x!tpu.dma_semaphore, #tpu.memory_space<semaphore_mem>> -> memref<!tpu.dma_semaphore, #tpu.memory_space<semaphore_mem>>
    tpu.wait_dma2 semaphore(%41 : memref<!tpu.dma_semaphore, #tpu.memory_space<semaphore_mem>>) src(%37 : memref<1x128xf32, #tpu.memory_space<any>>) dst(%39 : memref<1x128xf32, #tpu.memory_space<vmem>>)
    %c5_i32 = arith.constant 5 : i32
    %c0_i32_26 = arith.constant 0 : i32
    %c0_i32_27 = arith.constant 0 : i32
    %42 = tpu.memref_slice %arg3[%c0_i32_26, %c0_i32_27] : memref<64x128xf32, #tpu.memory_space<any>> -> memref<1x128xf32, #tpu.memory_space<any>>
    %c0_i32_28 = arith.constant 0 : i32
    %43 = tpu.memref_slice %arg6[%9, %c5_i32, %c0_i32_28] : memref<2x8x128xf32, #tpu.memory_space<vmem>> -> memref<1x1x128xf32, #tpu.memory_space<vmem>>
    %44 = tpu.memref_squeeze %43 : memref<1x1x128xf32, #tpu.memory_space<vmem>> -> memref<1x128xf32, #tpu.memory_space<vmem>>
    %45 = tpu.memref_slice %arg7[%9] : memref<2x!tpu.dma_semaphore, #tpu.memory_space<semaphore_mem>> -> memref<1x!tpu.dma_semaphore, #tpu.memory_space<semaphore_mem>>
    %46 = tpu.memref_squeeze %45 : memref<1x!tpu.dma_semaphore, #tpu.memory_space<semaphore_mem>> -> memref<!tpu.dma_semaphore, #tpu.memory_space<semaphore_mem>>
    tpu.wait_dma2 semaphore(%46 : memref<!tpu.dma_semaphore, #tpu.memory_space<semaphore_mem>>) src(%42 : memref<1x128xf32, #tpu.memory_space<any>>) dst(%44 : memref<1x128xf32, #tpu.memory_space<vmem>>)
    %c6_i32 = arith.constant 6 : i32
    %c0_i32_29 = arith.constant 0 : i32
    %c0_i32_30 = arith.constant 0 : i32
    %47 = tpu.memref_slice %arg3[%c0_i32_29, %c0_i32_30] : memref<64x128xf32, #tpu.memory_space<any>> -> memref<1x128xf32, #tpu.memory_space<any>>
    %c0_i32_31 = arith.constant 0 : i32
    %48 = tpu.memref_slice %arg6[%9, %c6_i32, %c0_i32_31] : memref<2x8x128xf32, #tpu.memory_space<vmem>> -> memref<1x1x128xf32, #tpu.memory_space<vmem>>
    %49 = tpu.memref_squeeze %48 : memref<1x1x128xf32, #tpu.memory_space<vmem>> -> memref<1x128xf32, #tpu.memory_space<vmem>>
    %50 = tpu.memref_slice %arg7[%9] : memref<2x!tpu.dma_semaphore, #tpu.memory_space<semaphore_mem>> -> memref<1x!tpu.dma_semaphore, #tpu.memory_space<semaphore_mem>>
    %51 = tpu.memref_squeeze %50 : memref<1x!tpu.dma_semaphore, #tpu.memory_space<semaphore_mem>> -> memref<!tpu.dma_semaphore, #tpu.memory_space<semaphore_mem>>
    tpu.wait_dma2 semaphore(%51 : memref<!tpu.dma_semaphore, #tpu.memory_space<semaphore_mem>>) src(%47 : memref<1x128xf32, #tpu.memory_space<any>>) dst(%49 : memref<1x128xf32, #tpu.memory_space<vmem>>)
    %c7_i32 = arith.constant 7 : i32
    %c0_i32_32 = arith.constant 0 : i32
    %c0_i32_33 = arith.constant 0 : i32
    %52 = tpu.memref_slice %arg3[%c0_i32_32, %c0_i32_33] : memref<64x128xf32, #tpu.memory_space<any>> -> memref<1x128xf32, #tpu.memory_space<any>>
    %c0_i32_34 = arith.constant 0 : i32
    %53 = tpu.memref_slice %arg6[%9, %c7_i32, %c0_i32_34] : memref<2x8x128xf32, #tpu.memory_space<vmem>> -> memref<1x1x128xf32, #tpu.memory_space<vmem>>
    %54 = tpu.memref_squeeze %53 : memref<1x1x128xf32, #tpu.memory_space<vmem>> -> memref<1x128xf32, #tpu.memory_space<vmem>>
    %55 = tpu.memref_slice %arg7[%9] : memref<2x!tpu.dma_semaphore, #tpu.memory_space<semaphore_mem>> -> memref<1x!tpu.dma_semaphore, #tpu.memory_space<semaphore_mem>>
    %56 = tpu.memref_squeeze %55 : memref<1x!tpu.dma_semaphore, #tpu.memory_space<semaphore_mem>> -> memref<!tpu.dma_semaphore, #tpu.memory_space<semaphore_mem>>
    tpu.wait_dma2 semaphore(%56 : memref<!tpu.dma_semaphore, #tpu.memory_space<semaphore_mem>>) src(%52 : memref<1x128xf32, #tpu.memory_space<any>>) dst(%54 : memref<1x128xf32, #tpu.memory_space<vmem>>)
    %c8_i32 = arith.constant 8 : i32
    %c8_i32_35 = arith.constant 8 : i32
    %57 = arith.muli %arg1, %c8_i32_35 : i32
    %58 = tpu.assume_multiple %57, 8 : i32
    %59 = arith.index_cast %58 : i32 to index
    %c0 = arith.constant 0 : index
    %60 = vector.load %arg4[%59, %c0] : memref<8x128xf32, #tpu.memory_space<vmem>>, vector<8x128xf32>
    %61 = arith.index_cast %9 : i32 to index
    %c0_36 = arith.constant 0 : index
    %c0_37 = arith.constant 0 : index
    %62 = vector.load %arg6[%61, %c0_36, %c0_37] : memref<2x8x128xf32, #tpu.memory_space<vmem>>, vector<1x8x128xf32>
    %63 = vector.shape_cast %62 : vector<1x8x128xf32> to vector<8x128xf32>
    %64 = arith.addf %63, %60 : vector<8x128xf32>
    %c0_38 = arith.constant 0 : index
    %c0_39 = arith.constant 0 : index
    %c0_40 = arith.constant 0 : index
    %65 = vector.load %arg5[%c0_38, %c0_39, %c0_40] : memref<1x8x128xf32, #tpu.memory_space<vmem>>, vector<1x8x128xf32>
    %66 = vector.shape_cast %65 : vector<1x8x128xf32> to vector<8x128xf32>
    %67 = vector.shape_cast %64 : vector<8x128xf32> to vector<1x8x128xf32>
    tpu.vector_store %arg5[%c0_38, %c0_39, %c0_40], %67 {strides = array<i32>} : memref<1x8x128xf32, #tpu.memory_space<vmem>>, vector<1x8x128xf32>,
    return
  }
  func.func @transform_1(%arg0: i32, %arg1: i32, %arg2: memref<16xi32, #tpu.memory_space<smem>>) -> (i32, i32) {
    %c0_i32 = arith.constant 0 : i32
    %c0_i32_0 = arith.constant 0 : i32
    %c0_i32_1 = arith.constant 0 : i32
    return %c0_i32, %c0_i32_0 : i32, i32
  }
  func.func @transform_2(%arg0: i32, %arg1: i32, %arg2: memref<16xi32, #tpu.memory_space<smem>>) -> (i32, i32, i32) {
    %c0_i32 = arith.constant 0 : i32
    %c0_i32_0 = arith.constant 0 : i32
    return %arg0, %arg1, %c0_i32 : i32, i32, i32
  }
}

</mosaic_0001>

<bundles_post_ra>
// kernel: tpu_custom_call.1
= control target key start
LH: loop header
LB: loop body
LE: loop exit
PB: predicated region body
PF: predicated region fallthrough
CT: control target
= control target key end

     0   :  { %s1202_s15 = smov [#allocation5]   ;;  %s1464_s0 = inlined_call_operand.hbm [shape: s32[16], index: 0, kind: input, shape index: {}]   ;;  %s1465_s1 = inlined_call_operand.hbm [shape: f32[64,128], index: 1, kind: input, shape index: {}]   ;;  %s1466_s2 = inlined_call_operand.hbm [shape: f32[8,128], index: 2, kind: input, shape index: {}]   ;;  %s1467_s3 = inlined_call_operand.hbm [shape: f32[2,8,128], index: 3, kind: output, shape index: {}]  }
   0x1   :  { %s9_s14 = sshll.u32 %s1464_s0, 4  ;;  %s10_s14 = int_to_ptr.hbm [resolvable:$true] %s9_s14 }
   0x2   :  { %12 = dma.hbm_to_smem %s10_s14, 16, %s1202_s15, [#allocation4] }
   0x3   :  { %1166 = dma.done.wait [#allocation4], 16 }
   0x4   :  { %1167 = vsyncadd [#allocation4], 4294967280 }
   0x5   :  { %15 = sfence }
   0x6   :  { %16 = vsyncpa [#allocation7], 0 }
   0x7   :  { %17 = vsyncpa [#allocation8], 0 }
   0x8   :  { %19 = vsyncpa [#allocation8 + $0x1], 0  ;;  %s1235_s16 = smov 0   ;;  %s1237_s17 = smov 0  }
   0x9   :  { %s1239_s18 = smov 0   ;;  %s1241_s19 = smov 0  }
   0xa   :  { %s1243_s20 = smov 0   ;;  %s1245_s0 = smov 0  }
   0xb LB: > { %s671_s21 = sadd.s32 4294967295, %s1200_s0   ;;  %s672_s22 = sadd.s32 4294967294, %s1200_s0   ;;  %s1200_s0 = sphi %s1245_s0, %s25_s0   ;;  %s1196_s20 = sphi %s1243_s20, %s1476_s20   ;;  %s1192_s19 = sphi %s1241_s19, %s1475_s19   ;;  %s1188_s18 = sphi %s1239_s18, %s1474_s18   ;;  %s1184_s17 = sphi %s1237_s17, %s1473_s17   ;;  %s1180_s16 = sphi %s1235_s16, %s1472_s16  }
   0xc   : > { %s37_s23 = sadd.s32 1, %s1196_s20  ;;  %s67_s24 = sadd.s32 1, %s1188_s18 }
   0xd   : > { %p39_p0 = scmp.ge.s32.totalorder %s37_s23, 2  ;;  %p77_p1 = scmp.ne.s32.totalorder %s1188_s18, %s1184_s17 }
   0xe   : > { %p78_p2 = scmp.eq.s32.totalorder %s671_s21, 1  ;;  %p83_p3 = scmp.ne.s32.totalorder %s1184_s17, %s1180_s16 }
   0xf   : > { %s1478_s23 = smov (%p39_p0, %s37_s23), 0  ;;  %p84_p5 = scmp.eq.s32.totalorder %s672_s22, 1 }
  0x10   : > { %p1275_p4 = por %p78_p2, %p77_p1  ;;  %s62_s26 = ssub.s32 %s1196_s20, %s1478_s23 }
  0x11   : > { %p673_p6 = scmp.ge.s32.totalorder %s1200_s0, 1  ;;  %p65_p7 = scmp.eq.s32.totalorder %s62_s26, 0 }
  0x12   : > { %p1282_p8 = por %p84_p5, %p83_p3  ;;  %p91_p9 = scmp.lt.s32.totalorder %s1200_s0, 3 }
  0x13   : > { %s1288_s28 = scalar_select %p65_p7, %s1188_s18, %s67_s24  }
  0x14   : > { %p92_p10 = pnand %p673_p6, %p91_p9  ;;  %p819_p11 = scmp.eq.s32.totalorder %s671_s21, 0 }
  0x15   : > { %s103_s4 = sshll.u32 %s1466_s2, 4  ;;  %s1203_s5 = smov [#allocation6]   ;;  %s104_s4 = int_to_ptr.hbm [resolvable:$true] %s103_s4 }
  0x16   : > { %p811_p12 = pneg %p92_p10  ;;  %s105_s6 = sshll.u32 %s1203_s5, 4  ;;  %s106_s6 = int_to_ptr.vmem [resolvable:$true] %s105_s6 }
  0x17   : > { %118 = sbr.rel (%p92_p10) target bundleno = 176 (0xb0), region = 24 }
  0x18   : > { %p812_p13 = pnand %p819_p11, %p811_p12 }
  0x1a   : > { %814 = dma.hbm_to_vmem [thread:$0]  (!%p812_p13), %s104_s4, 128, %s106_s6, [#allocation7]  }
  0x1c   : > { %1169 = dma.done.wait (%p819_p11), [#allocation7], 128  }
  0x1d   : > { %1171 = vsyncadd (%p819_p11), [#allocation7], 4294967168  ;;  %s1468_s7 = sand.u32 1, %s1184_s17   ;;  %s1295_s8 = sshll.u32 %s1192_s19, 3 }
  0x1e   : > { %s1299_s9 = sshll.u32 %s1468_s7, 3  ;;  %s151_s10 = sld [smem:[#allocation5 + %s1295_s8]] }
  0x1f   : > { %s170_s11 = sadd.s32 1, %s1295_s8  ;;  %s1204_s12 = smov [#allocation2]  }
  0x20   : > { %s1303_s13 = sshll.u32 %s1204_s12, 4  ;;  %s1305_s14 = sld [smem:[#allocation5 + %s170_s11]]  ;;  %s167_s13 = int_to_ptr.vmem [resolvable:$true] %s1303_s13 }
  0x21   : > { %s191_s15 = sadd.s32 2, %s1295_s8  ;;  %s1205_s19 = smov [#allocation2 + $0x1]  }
  0x22   : > { %s1308_s21 = sshll.u32 %s1205_s19, 4  ;;  %s1310_s22 = sld [smem:[#allocation5 + %s191_s15]]  ;;  %s188_s21 = int_to_ptr.vmem [resolvable:$true] %s1308_s21 }
  0x23   : > { %s1325_s15 = scalar_lea.hbm %s1465_s1, 64 }
  0x24   : > { %p152_p0 = scmp.gt.s32.totalorder %s151_s10, 0  ;;  %p679_p1 = scmp.lt.s32.totalorder %s151_s10, 63 }
  0x26   : > { %s1480_s10 = smov (!%p152_p0, %s151_s10), 0  ;;  %p172_p2 = scmp.gt.s32.totalorder %s1305_s14, 0 }
  0x27   : > { %s1482_s10 = smov (!%p679_p1, %s1480_s10), 63  ;;  %p684_p3 = scmp.lt.s32.totalorder %s1305_s14, 63 }
  0x28   : > { %s173_s24 = scalar_select %p172_p2, %s1305_s14, 0 }
  0x29   : > { %s156_s30 = scalar_lea.hbm %s1465_s1, %s1482_s10  ;;  %p193_p5 = scmp.gt.s32.totalorder %s1310_s22, 0 }
  0x2a   : > { %s164_s4 = sshll.u32 %s156_s30, 4  ;;  %p689_p6 = scmp.lt.s32.totalorder %s1310_s22, 63  ;;  %s165_s4 = int_to_ptr.hbm [resolvable:$true] %s164_s4 }
  0x2b   : > { %s922_s5 = sshra.s32 %s165_s4, 4  ;;  %s923_s5 = int_to_ptr.hbm [resolvable:$true] %s922_s5 }
  0x2c   : > { %s924_s6 = scalar_lea.hbm %s923_s5, 1  ;;  %p927_p9 = scmp.lt.s32.totalorder %s923_s5, %s1465_s1 }
  0x2d   : > { %p925_p7 = scmp.ne.s32.totalorder %s923_s5, %s924_s6  ;;  %p928_p10 = scmp.lt.s32.totalorder %s1325_s15, %s924_s6 }
  0x2f   : > { %p929_p11 = por %p928_p10, %p927_p9 }
  0x31   : > { %p930_p12 = pnand %p929_p11, %p925_p7 }
  0x33   : > { %933 = shalt.err (!%p930_p12)  }
  0x34   : > { %169 = dma.hbm_to_vmem [thread:$0]  %s165_s4, 16, %s167_s13, [#allocation3] }
  0x35   : > { %s1484_s24 = smov (!%p684_p3, %s173_s24), 63  ;;  %s1206_s30 = smov [#allocation2 + $0x2]  }
  0x36   : > { %s194_s10 = scalar_select %p193_p5, %s1310_s22, 0 }
  0x37   : > { %s176_s7 = scalar_lea.hbm %s1465_s1, %s1484_s24  ;;  %s1339_s5 = sshll.u32 %s1206_s30, 4  ;;  %s209_s5 = int_to_ptr.vmem [resolvable:$true] %s1339_s5 }
  0x38   : > { %s185_s6 = sshll.u32 %s176_s7, 4  ;;  %s212_s11 = sadd.s32 3, %s1295_s8  ;;  %s186_s6 = int_to_ptr.hbm [resolvable:$true] %s185_s6 }
  0x39   : > { %s1342_s13 = sld [smem:[#allocation5 + %s212_s11]]  ;;  %s946_s14 = sshra.s32 %s186_s6, 4  ;;  %s947_s14 = int_to_ptr.hbm [resolvable:$true] %s946_s14 }
  0x3a   : > { %s948_s4 = scalar_lea.hbm %s947_s14, 1  ;;  %p951_p0 = scmp.lt.s32.totalorder %s947_s14, %s1465_s1 }
  0x3b   : > { %p949_p13 = scmp.ne.s32.totalorder %s947_s14, %s948_s4  ;;  %p952_p1 = scmp.lt.s32.totalorder %s1325_s15, %s948_s4 }
  0x3d   : > { %p953_p2 = por %p952_p1, %p951_p0 }
  0x3f   : > { %p954_p3 = pnand %p953_p2, %p949_p13 }
  0x41   : > { %957 = shalt.err (!%p954_p3)  }
  0x42   : > { %190 = dma.hbm_to_vmem [thread:$0]  %s186_s6, 16, %s188_s21, [#allocation3] }
  0x43   : > { %s1486_s10 = smov (!%p689_p6, %s194_s10), 63  ;;  %s233_s7 = sadd.s32 4, %s1295_s8 }
  0x44   : > { %s197_s29 = scalar_lea.hbm %s1465_s1, %s1486_s10  ;;  %s1207_s11 = smov [#allocation2 + $0x3]  }
  0x45   : > { %s206_s30 = sshll.u32 %s197_s29, 4  ;;  %s1357_s14 = sshll.u32 %s1207_s11, 4  ;;  %s207_s30 = int_to_ptr.hbm [resolvable:$true] %s206_s30  ;;  %s230_s14 = int_to_ptr.vmem [resolvable:$true] %s1357_s14 }
  0x46   : > { %p214_p5 = scmp.gt.s32.totalorder %s1342_s13, 0  ;;  %s970_s4 = sshra.s32 %s207_s30, 4  ;;  %s971_s4 = int_to_ptr.hbm [resolvable:$true] %s970_s4 }
  0x47   : > { %s972_s12 = scalar_lea.hbm %s971_s4, 1  ;;  %p975_p6 = scmp.lt.s32.totalorder %s971_s4, %s1465_s1 }
  0x48   : > { %p973_p7 = scmp.ne.s32.totalorder %s971_s4, %s972_s12  ;;  %p976_p9 = scmp.lt.s32.totalorder %s1325_s15, %s972_s12 }
  0x4a   : > { %p977_p10 = por %p976_p9, %p975_p6 }
  0x4c   : > { %p978_p11 = pnand %p977_p10, %p973_p7 }
  0x4e   : > { %981 = shalt.err (!%p978_p11)  }
  0x4f   : > { %211 = dma.hbm_to_vmem [thread:$0]  %s207_s30, 16, %s209_s5, [#allocation3] }
  0x50   : > { %s215_s22 = scalar_select %p214_p5, %s1342_s13, 0 }
  0x51   : > { %p694_p12 = scmp.lt.s32.totalorder %s1342_s13, 63  ;;  %s234_s10 = sld [smem:[#allocation5 + %s233_s7]] }
  0x52   : > { %s254_s6 = sadd.s32 5, %s1295_s8  ;;  %s1208_s24 = smov [#allocation2 + $0x4]  }
  0x53   : > { %s1488_s22 = smov (!%p694_p12, %s215_s22), 63  ;;  %s1367_s26 = sshll.u32 %s1208_s24, 4  ;;  %s251_s26 = int_to_ptr.vmem [resolvable:$true] %s1367_s26 }
  0x54   : > { %s1369_s29 = sld [smem:[#allocation5 + %s254_s6]]  ;;  %s218_s5 = scalar_lea.hbm %s1465_s1, %s1488_s22 }
  0x55   : > { %s227_s30 = sshll.u32 %s218_s5, 4  ;;  %s228_s30 = int_to_ptr.hbm [resolvable:$true] %s227_s30 }
  0x56   : > { %s994_s13 = sshra.s32 %s228_s30, 4  ;;  %s995_s13 = int_to_ptr.hbm [resolvable:$true] %s994_s13 }
  0x57   : > { %p235_p13 = scmp.gt.s32.totalorder %s234_s10, 0  ;;  %s996_s7 = scalar_lea.hbm %s995_s13, 1 }
  0x58   : > { %p997_p0 = scmp.ne.s32.totalorder %s995_s13, %s996_s7  ;;  %p999_p1 = scmp.lt.s32.totalorder %s995_s13, %s1465_s1 }
  0x59   : > { %p1000_p2 = scmp.lt.s32.totalorder %s1325_s15, %s996_s7 }
  0x5b   : > { %p1001_p3 = por %p1000_p2, %p999_p1 }
  0x5d   : > { %p1002_p5 = pnand %p1001_p3, %p997_p0 }
  0x5f   : > { %1005 = shalt.err (!%p1002_p5)  }
  0x60   : > { %232 = dma.hbm_to_vmem [thread:$0]  %s228_s30, 16, %s230_s14, [#allocation3] }
  0x61   : > { %s236_s21 = scalar_select %p235_p13, %s234_s10, 0 }
  0x62   : > { %p699_p7 = scmp.lt.s32.totalorder %s234_s10, 63  ;;  %p256_p6 = scmp.gt.s32.totalorder %s1369_s29, 0 }
  0x63   : > { %p704_p9 = scmp.lt.s32.totalorder %s1369_s29, 63  ;;  %s1209_s4 = smov [#allocation2 + $0x5]  }
  0x64   : > { %s1490_s21 = smov (!%p699_p7, %s236_s21), 63  ;;  %s1386_s5 = sshll.u32 %s1209_s4, 4  ;;  %s272_s5 = int_to_ptr.vmem [resolvable:$true] %s1386_s5 }
  0x65   : > { %s257_s22 = scalar_select %p256_p6, %s1369_s29, 0 }
  0x66   : > { %s239_s11 = scalar_lea.hbm %s1465_s1, %s1490_s21  ;;  %s275_s14 = sadd.s32 6, %s1295_s8 }
  0x67   : > { %s248_s13 = sshll.u32 %s239_s11, 4  ;;  %s1389_s30 = sld [smem:[#allocation5 + %s275_s14]]  ;;  %s249_s13 = int_to_ptr.hbm [resolvable:$true] %s248_s13 }
  0x68   : > { %s1018_s7 = sshra.s32 %s249_s13, 4  ;;  %s1019_s7 = int_to_ptr.hbm [resolvable:$true] %s1018_s7 }
  0x69   : > { %s1020_s10 = scalar_lea.hbm %s1019_s7, 1  ;;  %p1023_p11 = scmp.lt.s32.totalorder %s1019_s7, %s1465_s1 }
  0x6a   : > { %p1021_p10 = scmp.ne.s32.totalorder %s1019_s7, %s1020_s10  ;;  %p1024_p12 = scmp.lt.s32.totalorder %s1325_s15, %s1020_s10 }
  0x6c   : > { %p1025_p13 = por %p1024_p12, %p1023_p11 }
  0x6e   : > { %p1026_p0 = pnand %p1025_p13, %p1021_p10 }
  0x70   : > { %1029 = shalt.err (!%p1026_p0)  }
  0x71   : > { %253 = dma.hbm_to_vmem [thread:$0]  %s249_s13, 16, %s251_s26, [#allocation3] }
  0x72   : > { %s1492_s22 = smov (!%p704_p9, %s257_s22), 63  ;;  %s296_s4 = sadd.s32 7, %s1295_s8 }
  0x73   : > { %s260_s24 = scalar_lea.hbm %s1465_s1, %s1492_s22  ;;  %p277_p1 = scmp.gt.s32.totalorder %s1389_s30, 0 }
  0x74   : > { %s269_s11 = sshll.u32 %s260_s24, 4  ;;  %s270_s11 = int_to_ptr.hbm [resolvable:$true] %s269_s11 }
  0x75   : > { %s1042_s14 = sshra.s32 %s270_s11, 4  ;;  %s1043_s14 = int_to_ptr.hbm [resolvable:$true] %s1042_s14 }
  0x76   : > { %s1044_s7 = scalar_lea.hbm %s1043_s14, 1  ;;  %p1047_p3 = scmp.lt.s32.totalorder %s1043_s14, %s1465_s1 }
  0x77   : > { %p1045_p2 = scmp.ne.s32.totalorder %s1043_s14, %s1044_s7  ;;  %p1048_p5 = scmp.lt.s32.totalorder %s1325_s15, %s1044_s7 }
  0x79   : > { %p1049_p7 = por %p1048_p5, %p1047_p3 }
  0x7b   : > { %p1050_p6 = pnand %p1049_p7, %p1045_p2 }
  0x7d   : > { %1053 = shalt.err (!%p1050_p6)  }
  0x7e   : > { %274 = dma.hbm_to_vmem [thread:$0]  %s270_s11, 16, %s272_s5, [#allocation3] }
  0x7f   : > { %s278_s26 = scalar_select %p277_p1, %s1389_s30, 0 }
  0x80   : > { %p709_p9 = scmp.lt.s32.totalorder %s1389_s30, 63  ;;  %s297_s29 = sld [smem:[#allocation5 + %s296_s4]] }
  0x81   : > { %s1210_s22 = smov [#allocation2 + $0x6]  }
  0x82   : > { %s292_s13 = sshll.u32 %s1210_s22, 4  ;;  %s1494_s26 = smov (!%p709_p9, %s278_s26), 63  ;;  %s293_s13 = int_to_ptr.vmem [resolvable:$true] %s292_s13 }
  0x83   : > { %s281_s6 = scalar_lea.hbm %s1465_s1, %s1494_s26 }
  0x84   : > { %s290_s24 = sshll.u32 %s281_s6, 4  ;;  %s291_s24 = int_to_ptr.hbm [resolvable:$true] %s290_s24 }
  0x85   : > { %s1066_s14 = sshra.s32 %s291_s24, 4  ;;  %s1067_s14 = int_to_ptr.hbm [resolvable:$true] %s1066_s14 }
  0x86   : > { %p298_p10 = scmp.gt.s32.totalorder %s297_s29, 0  ;;  %s1068_s5 = scalar_lea.hbm %s1067_s14, 1 }
  0x87   : > { %p1069_p11 = scmp.ne.s32.totalorder %s1067_s14, %s1068_s5  ;;  %p1071_p12 = scmp.lt.s32.totalorder %s1067_s14, %s1465_s1 }
  0x88   : > { %p1072_p13 = scmp.lt.s32.totalorder %s1325_s15, %s1068_s5 }
  0x8a   : > { %p1073_p0 = por %p1072_p13, %p1071_p12 }
  0x8c   : > { %p1074_p1 = pnand %p1073_p0, %p1069_p11 }
  0x8e   : > { %1077 = shalt.err (!%p1074_p1)  }
  0x8f   : > { %295 = dma.hbm_to_vmem [thread:$0]  %s291_s24, 16, %s293_s13, [#allocation3] }
  0x90   : > { %s299_s30 = scalar_select %p298_p10, %s297_s29, 0 }
  0x91   : > { %p714_p2 = scmp.lt.s32.totalorder %s297_s29, 63  ;;  %s1211_s4 = smov [#allocation2 + $0x7]  }
  0x92   : > { %s313_s10 = sshll.u32 %s1211_s4, 4  ;;  %s314_s10 = int_to_ptr.vmem [resolvable:$true] %s313_s10 }
  0x93   : > { %s1496_s30 = smov (!%p714_p2, %s299_s30), 63 }
  0x94   : > { %s302_s22 = scalar_lea.hbm %s1465_s1, %s1496_s30 }
  0x95   : > { %s311_s19 = sshll.u32 %s302_s22, 4  ;;  %s312_s19 = int_to_ptr.hbm [resolvable:$true] %s311_s19 }
  0x96   : > { %s1090_s21 = sshra.s32 %s312_s19, 4  ;;  %s1091_s21 = int_to_ptr.hbm [resolvable:$true] %s1090_s21 }
  0x97   : > { %s1092_s6 = scalar_lea.hbm %s1091_s21, 1  ;;  %p1095_p5 = scmp.lt.s32.totalorder %s1091_s21, %s1465_s1 }
  0x98   : > { %p1093_p3 = scmp.ne.s32.totalorder %s1091_s21, %s1092_s6  ;;  %p1096_p7 = scmp.lt.s32.totalorder %s1325_s15, %s1092_s6 }
  0x9a   : > { %p1097_p6 = por %p1096_p7, %p1095_p5 }
  0x9c   : > { %p1098_p9 = pnand %p1097_p6, %p1093_p3 }
  0x9e   : > { %1101 = shalt.err (!%p1098_p9)  }
  0x9f   : > { %316 = dma.hbm_to_vmem [thread:$0]  %s312_s19, 16, %s314_s10, [#allocation3] }
  0xa0   : > { %s133_s29 = scalar_lea.vmem [#allocation9], %s1299_s9 }
  0xa1   : > { %1172 = dma.done.wait [#allocation3], 128 }
  0xa2   : > { %1173 = vsyncadd [#allocation3], 4294967168  ;;  %s540_s11 = scalar_lea.hbm %s1467_s3, %s1295_s8  ;;  %s542_s7 = sshll.u32 %s133_s29, 4  ;;  %v522_v0 = vld [vmem:[#allocation6] sm:$0xff]  ;;  %v525_v1 = vld [vmem:[#allocation2] sm:$0xff]  ;;  %s543_s7 = int_to_ptr.vmem [resolvable:$true] %s542_s7 }
  0xa3   : > { %s544_s30 = sshll.u32 %s540_s11, 4  ;;  %v526_v2 = vadd.f32 %v525_v1, %v522_v0  ;;  %s1471_s15 = sand.u32 1, %s1184_s17   ;;  %s545_s30 = int_to_ptr.hbm [resolvable:$true] %s544_s30 }
  0xa4   : > { %s529_s4 = scalar_lea.sflag [#allocation8], %s1471_s15  ;;  %s1128_s9 = sshra.s32 %s545_s30, 4  ;;  %s1129_s9 = int_to_ptr.hbm [resolvable:$true] %s1128_s9 }
  0xa5   : > { %527 = vst [vmem:[%s133_s29] sm:$0xff] %v526_v2  ;;  %s1130_s10 = scalar_lea.hbm %s1129_s9, 8  ;;  %s1134_s8 = scalar_lea.hbm %s1467_s3, 16 }
  0xa6   : > { %p1131_p10 = scmp.ne.s32.totalorder %s1129_s9, %s1130_s10  ;;  %p1135_p13 = scmp.lt.s32.totalorder %s1129_s9, %s1467_s3 }
  0xa7   : > { %p1136_p0 = scmp.lt.s32.totalorder %s1134_s8, %s1130_s10 }
  0xa8   : > { %p1132_p11 = pnand %p1131_p10, %p1275_p4 }
  0xa9   : > { %p1137_p1 = por %p1136_p0, %p1135_p13 }
  0xaa   : > { %p1133_p12 = pneg %p1132_p11 }
  0xac   : > { %p1138_p2 = pnand %p1137_p1, %p1133_p12 }
  0xae   : > { %1141 = shalt.err (!%p1138_p2)
}
  0xaf   : > { %809 = dma.vmem_to_hbm [thread:$0]  (%p1275_p4), %s543_s7, 128, %s545_s30, %s529_s4  }
  0xb0 PF: > { %p821_p3 = scmp.ge.s32.totalorder %s1200_s0, 2  ;;  %s556_s21 = sand.u32 1, %s1180_s16  }
  0xb1   : > { %s557_s6 = scalar_lea.sflag [#allocation8], %s556_s21 }
  0xb2   : > { %p816_p5 = pnand %p821_p3, %p1282_p8 }
  0xb4   : > { %p817_p7 = pneg %p816_p5 }
  0xb6   : > { %1175 = dma.done.wait (%p817_p7), %s557_s6, 128  }
  0xb7   : > { %1177 = vsyncadd (%p817_p7), %s557_s6, 4294967168  ;;  %s25_s0 = sadd.s32 1, %s1200_s0   ;;  %s1472_s16 = smov %s1184_s17 }
  0xb8   : > { %p22_p6 = scmp.ge.s32.totalorder %s25_s0, 4   ;;  %s1473_s17 = smov %s1188_s18 }
  0xb9   : > { %s1474_s18 = smov %s1288_s28  ;;  %s1475_s19 = smov %s1196_s20 }
  0xba   : > { %s1476_s20 = smov %s1478_s23  ;;  %24 = sbr.rel (!%p22_p6) target bundleno = 11 (0xb), region = 169 }
  0xbf   :  { %563 = vsyncpa [#allocation7], 1 }
  0xc0   :  { %565 = vsyncpa [#allocation7 + $0x1], 1 }
  0xc1   :  { %566 = vsyncpa [#allocation8], 1 }
  0xc2   :  { %568 = vsyncpa [#allocation8 + $0x1], 1 }
  0xc3   :  { %569 = vsyncmov [#allocation3] }
  0xc6   :  { %s570_s25 = vpop.sfrf %569 }
  0xc7   :  { %p771_p4 = scmp.ne.s32.totalorder %s570_s25, 0 }
  0xc9   :  { %574 = shalt.err (%p771_p4)  }
  0xca   :  { %576 = vsyncmov [#allocation3 + $0x1] }
  0xcd   :  { %s577_s27 = vpop.sfrf %576 }
  0xce   :  { %p772_p8 = scmp.ne.s32.totalorder %s577_s27, 0 }
  0xd0   :  { %581 = shalt.err (%p772_p8)  }

</bundles_post_ra>
